<compile_context>
chip_gen: v7x
topology: tpu7x:2x2x1
jax: 0.10.0
libtpu: 0.0.40
codegen_flags: <defaults>
</compile_context>

<pallas_src>
import jax
import jax.numpy as jnp
from jax.experimental import pallas as pl
from jax.experimental.pallas import tpu as pltpu

# ---- model config (mirrors args: conv_type='MLP', conv_depth=2, act_type='leaky') ----
NUM_NODES    = 64
DIM_FEATURES = 32
DIM_HIDDENS  = 32
DIM_EMBS     = 32     # must equal DIM_HIDDENS for y[nids] = h to be shape-consistent
CONV_DEPTH   = 2
NEG_SLOPE    = 0.01   # nn.LeakyReLU default

LANE         = 128    # pad channel dims to full lane width
MAX_ROW_TILE = 256    # rows per grid step once batches grow (matches v6e/v7x MXU depth)


def _round_up(x, m):
    return ((x + m - 1) // m) * m


def _pad2d(a, rows, cols):
    return jnp.pad(a, ((0, rows - a.shape[0]), (0, cols - a.shape[1])))


def _leaky(h):
    return jnp.where(h > 0, h, NEG_SLOPE * h)


def fused_mlp_kernel(nids_ref,                       # SMEM (m_pad,) int32 (scalar prefetch)
                     x_hbm,                          # HBM (ANY): (nn_pad, f_pad) f32
                     w0_ref, b0_ref, w1_ref, b1_ref, w2_ref, b2_ref,
                     h_ref,                          # out: (row_tile, e_pad) f32
                     x_tile, sem):                   # scratch: VMEM gather buf + DMA sem
    """DMA row-gather x[nids] -> 3 Linear layers with leaky-ReLU -> per-tile h output."""
    row_tile = h_ref.shape[0]
    base = pl.program_id(0) * row_tile

    # ---- gather: x_tile[r, :] = x_all[nids[base + r], :] via per-row async DMA ----
    # Padded batch rows carry sentinel nid 0 (valid row); their outputs are sliced
    # off in the wrapper, so the extra DMAs/compute are harmless.
    @pl.loop(0, row_tile)
    def _(r):
        nid = nids_ref[base + r]
        pltpu.make_async_copy(x_hbm.at[pl.ds(nid, 1), :],
                              x_tile.at[pl.ds(r, 1), :],
                              sem.at[0]).start()

    # All copies have identical size, so waiting row_tile times on the shared
    # semaphore (dummy src/dst of the same shape) drains every outstanding copy.
    @pl.loop(0, row_tile)
    def _(r):
        pltpu.make_async_copy(x_hbm.at[pl.ds(0, 1), :],
                              x_tile.at[pl.ds(0, 1), :],
                              sem.at[0]).wait()

    # ---- MLP: feat_trans -> (act -> conv) x 2 ----
    h = jnp.dot(x_tile[...], w0_ref[...], preferred_element_type=jnp.float32) + b0_ref[...]
    h = _leaky(h)
    h = jnp.dot(h, w1_ref[...], preferred_element_type=jnp.float32) + b1_ref[...]
    h = _leaky(h)
    h = jnp.dot(h, w2_ref[...], preferred_element_type=jnp.float32) + b2_ref[...]

    h_ref[...] = h


def batched_model_forward(x_all, nids, params):
    """Equivalent of BatchedModel.forward(g, nids) for the MLP emb_model."""
    num_nodes, dim_features = x_all.shape
    (w0, b0), (w1, b1), (w2, b2) = params
    dim_hiddens = w0.shape[1]
    dim_embs = w2.shape[1]

    # lane-dense padding of channel dims; sublane-aligned node rows
    f_pad = _round_up(dim_features, LANE)
    h_pad = _round_up(dim_hiddens, LANE)
    e_pad = _round_up(dim_embs, LANE)
    nn_pad = _round_up(num_nodes, 8)

    m = nids.shape[0]
    row_tile = min(_round_up(m, 8), MAX_ROW_TILE)   # whole batch in one block if small
    m_pad = _round_up(m, row_tile)
    grid = (m_pad // row_tile,)

    x_p = _pad2d(x_all.astype(jnp.float32), nn_pad, f_pad)          # stays in HBM
    nids_pad = jnp.zeros((m_pad,), jnp.int32).at[:m].set(nids.astype(jnp.int32))

    w0p, b0p = _pad2d(w0, f_pad, h_pad), _pad2d(b0, 1, h_pad)
    w1p, b1p = _pad2d(w1, h_pad, h_pad), _pad2d(b1, 1, h_pad)
    w2p, b2p = _pad2d(w2, h_pad, e_pad), _pad2d(b2, 1, e_pad)

    resident = lambda i, nids_ref: (0, 0)   # small weights stay VMEM-resident

    h_out = pl.pallas_call(
        fused_mlp_kernel,
        out_shape=jax.ShapeDtypeStruct((m_pad, e_pad), jnp.float32),
        grid_spec=pltpu.PrefetchScalarGridSpec(
            num_scalar_prefetch=1,                               # nids -> SMEM
            grid=grid,
            in_specs=[
                pl.BlockSpec(memory_space=pl.ANY),               # x_all: raw HBM ref
                pl.BlockSpec((f_pad, h_pad), resident),          # feat_trans W
                pl.BlockSpec((1, h_pad), resident),              # feat_trans b
                pl.BlockSpec((h_pad, h_pad), resident),          # convs[0] W
                pl.BlockSpec((1, h_pad), resident),              # convs[0] b
                pl.BlockSpec((h_pad, e_pad), resident),          # convs[1] W
                pl.BlockSpec((1, e_pad), resident),              # convs[1] b
            ],
            out_specs=pl.BlockSpec((row_tile, e_pad), lambda i, nids_ref: (i, 0)),
            scratch_shapes=[
                pltpu.VMEM((row_tile, f_pad), jnp.float32),      # gathered x tile
                pltpu.SemaphoreType.DMA((1,)),                   # shared gather sem
            ],
        ),
        # row tiles are independent -> parallel (v7x megacore sharding)
        compiler_params=pltpu.CompilerParams(
            dimension_semantics=("parallel",),
            vmem_limit_bytes=32 * 1024 * 1024,
        ),
    )(nids_pad, x_p, w0p, b0p, w1p, b1p, w2p, b2p)

    # scatter in the wrapper: last-write-wins, same as torch `y[nids] = h`
    h = h_out[:m, :dim_embs]
    y = jnp.zeros((num_nodes, dim_embs), jnp.float32).at[nids].set(h)
    return y


def init_linear(key, fan_in, fan_out):
    """Deterministic init, torch.nn.Linear-style uniform(-1/sqrt(fan_in), 1/sqrt(fan_in))."""
    kw, kb = jax.random.split(key)
    bound = 1.0 / (fan_in ** 0.5)
    w = jax.random.uniform(kw, (fan_in, fan_out), jnp.float32, -bound, bound)
    b = jax.random.uniform(kb, (1, fan_out), jnp.float32, -bound, bound)
    return w, b


def reference_forward(x_all, nids, params):
    (w0, b0), (w1, b1), (w2, b2) = params
    h = x_all[nids] @ w0 + b0
    h = _leaky(h); h = h @ w1 + b1
    h = _leaky(h); h = h @ w2 + b2
    y = jnp.zeros((x_all.shape[0], w2.shape[1]), jnp.float32)
    return y.at[nids].set(h)


if __name__ == "__main__":
    key = jax.random.PRNGKey(0)
    kx, kn, k0, k1, k2 = jax.random.split(key, 5)

    # g.ndata['all'] equivalent
    x_all = jax.random.normal(kx, (NUM_NODES, DIM_FEATURES), jnp.float32)
    # selected node ids (batch of 16, unique)
    nids = jax.random.permutation(kn, NUM_NODES)[:16]

    params = (
        init_linear(k0, DIM_FEATURES, DIM_HIDDENS),  # feat_trans
        init_linear(k1, DIM_HIDDENS, DIM_HIDDENS),   # convs[0]
        init_linear(k2, DIM_HIDDENS, DIM_EMBS),      # convs[1]
    )

    embs = batched_model_forward(x_all, nids, params)
    embs = jax.block_until_ready(embs)

    ref = reference_forward(x_all, nids, params)
    assert embs.shape == (NUM_NODES, DIM_EMBS)
    assert jnp.allclose(embs, ref, atol=1e-5, rtol=1e-5)

    print("KERNEL_OK")
</pallas_src>

<mosaic_0001>
module attributes {stable_mosaic.version = 11 : i64} {
  func.func @fused_mlp_kernel(%arg0: i32, %arg1: memref<16xi32, #tpu.memory_space<smem>>, %arg2: memref<64x128xf32, #tpu.memory_space<any>>, %arg3: memref<128x128xf32, #tpu.memory_space<vmem>>, %arg4: memref<1x128xf32, #tpu.memory_space<vmem>>, %arg5: memref<128x128xf32, #tpu.memory_space<vmem>>, %arg6: memref<1x128xf32, #tpu.memory_space<vmem>>, %arg7: memref<128x128xf32, #tpu.memory_space<vmem>>, %arg8: memref<1x128xf32, #tpu.memory_space<vmem>>, %arg9: memref<16x128xf32, #tpu.memory_space<vmem>>, %arg10: memref<16x128xf32, #tpu.memory_space<vmem>>, %arg11: memref<1x!tpu.dma_semaphore, #tpu.memory_space<semaphore_mem>>) attributes {dimension_semantics = [#tpu.dimension_semantics<parallel>], iteration_bounds = array<i64: 1>, scalar_prefetch = 1 : i64, scratch_operands = 2 : i64, tpu.core_type = #tpu.core_type<tc>, window_params = [{}, {pipeline_mode = #tpu.pipeline_mode<synchronous>, transform_indices = @transform_1, window_bounds = array<i64: 128, 128>}, {pipeline_mode = #tpu.pipeline_mode<synchronous>, transform_indices = @transform_2, window_bounds = array<i64: 1, 128>}, {pipeline_mode = #tpu.pipeline_mode<synchronous>, transform_indices = @transform_3, window_bounds = array<i64: 128, 128>}, {pipeline_mode = #tpu.pipeline_mode<synchronous>, transform_indices = @transform_4, window_bounds = array<i64: 1, 128>}, {pipeline_mode = #tpu.pipeline_mode<synchronous>, transform_indices = @transform_5, window_bounds = array<i64: 128, 128>}, {pipeline_mode = #tpu.pipeline_mode<synchronous>, transform_indices = @transform_6, window_bounds = array<i64: 1, 128>}, {transform_indices = @transform_7, window_bounds = array<i64: 16, 128>}]} {
    %c16_i32 = arith.constant 16 : i32
    %0 = arith.muli %arg0, %c16_i32 : i32
    %c0_i32 = arith.constant 0 : i32
    %c16_i32_0 = arith.constant 16 : i32
    %1 = arith.addi %c0_i32, %c16_i32_0 : i32
    %c1_i32 = arith.constant 1 : i32
    scf.for %arg12 = %c0_i32 to %1 step %c1_i32  : i32 {
      %c1_i32_26 = arith.constant 1 : i32
      %30 = arith.muli %arg12, %c1_i32_26 : i32
      %c0_i32_27 = arith.constant 0 : i32
      %31 = arith.addi %c0_i32_27, %30 : i32
      %32 = arith.addi %0, %31 : i32
      %33 = arith.index_cast %32 : i32 to index
      %34 = memref.load %arg1[%33] : memref<16xi32, #tpu.memory_space<smem>>
      %c0_i32_28 = arith.constant 0 : i32
      %c0_i32_29 = arith.constant 0 : i32
      %35 = tpu.memref_slice %arg2[%34, %c0_i32_29] : memref<64x128xf32, #tpu.memory_space<any>> -> memref<1x128xf32, #tpu.memory_space<any>>
      %c0_i32_30 = arith.constant 0 : i32
      %36 = tpu.memref_slice %arg10[%31, %c0_i32_30] : memref<16x128xf32, #tpu.memory_space<vmem>> -> memref<1x128xf32, #tpu.memory_space<vmem>>
      %37 = tpu.memref_slice %arg11[%c0_i32_28] : memref<1x!tpu.dma_semaphore, #tpu.memory_space<semaphore_mem>> -> memref<1x!tpu.dma_semaphore, #tpu.memory_space<semaphore_mem>>
      %38 = tpu.memref_squeeze %37 : memref<1x!tpu.dma_semaphore, #tpu.memory_space<semaphore_mem>> -> memref<!tpu.dma_semaphore, #tpu.memory_space<semaphore_mem>>
      tpu.enqueue_dma source(%35 : memref<1x128xf32, #tpu.memory_space<any>>) target(%36 : memref<1x128xf32, #tpu.memory_space<vmem>>) target_semaphore(%38 : memref<!tpu.dma_semaphore, #tpu.memory_space<semaphore_mem>>)
    }
    %c16_i32_1 = arith.constant 16 : i32
    %c0_i32_2 = arith.constant 0 : i32
    %c16_i32_3 = arith.constant 16 : i32
    %2 = arith.addi %c0_i32_2, %c16_i32_3 : i32
    %c1_i32_4 = arith.constant 1 : i32
    scf.for %arg12 = %c0_i32_2 to %2 step %c1_i32_4  : i32 {
      %c0_i32_26 = arith.constant 0 : i32
      %c0_i32_27 = arith.constant 0 : i32
      %c0_i32_28 = arith.constant 0 : i32
      %30 = tpu.memref_slice %arg2[%c0_i32_27, %c0_i32_28] : memref<64x128xf32, #tpu.memory_space<any>> -> memref<1x128xf32, #tpu.memory_space<any>>
      %c0_i32_29 = arith.constant 0 : i32
      %c0_i32_30 = arith.constant 0 : i32
      %31 = tpu.memref_slice %arg10[%c0_i32_29, %c0_i32_30] : memref<16x128xf32, #tpu.memory_space<vmem>> -> memref<1x128xf32, #tpu.memory_space<vmem>>
      %32 = tpu.memref_slice %arg11[%c0_i32_26] : memref<1x!tpu.dma_semaphore, #tpu.memory_space<semaphore_mem>> -> memref<1x!tpu.dma_semaphore, #tpu.memory_space<semaphore_mem>>
      %33 = tpu.memref_squeeze %32 : memref<1x!tpu.dma_semaphore, #tpu.memory_space<semaphore_mem>> -> memref<!tpu.dma_semaphore, #tpu.memory_space<semaphore_mem>>
      tpu.wait_dma2 semaphore(%33 : memref<!tpu.dma_semaphore, #tpu.memory_space<semaphore_mem>>) src(%30 : memref<1x128xf32, #tpu.memory_space<any>>) dst(%31 : memref<1x128xf32, #tpu.memory_space<vmem>>)
    }
    %c0 = arith.constant 0 : index
    %c0_5 = arith.constant 0 : index
    %3 = vector.load %arg10[%c0, %c0_5] : memref<16x128xf32, #tpu.memory_space<vmem>>, vector<16x128xf32>
    %c0_6 = arith.constant 0 : index
    %c0_7 = arith.constant 0 : index
    %4 = vector.load %arg3[%c0_6, %c0_7] : memref<128x128xf32, #tpu.memory_space<vmem>>, vector<128x128xf32>
    %cst = arith.constant dense<0.000000e+00> : vector<16x128xf32>
    %5 = tpu.matmul %3, %4, %cst {dimension_numbers = #tpu.dot_dimension_numbers<[1], [0], [0], [1], [0, 0, 1, 1], [], []>} : vector<16x128xf32>, vector<128x128xf32>, vector<16x128xf32> -> vector<16x128xf32>
    %c0_8 = arith.constant 0 : index
    %c0_9 = arith.constant 0 : index
    %6 = vector.load %arg4[%c0_8, %c0_9] : memref<1x128xf32, #tpu.memory_space<vmem>>, vector<1x128xf32>
    %7 = vector.broadcast %6 : vector<1x128xf32> to vector<16x128xf32>
    %8 = arith.addf %5, %7 : vector<16x128xf32>
    %cst_10 = arith.constant 0.000000e+00 : f32
    %9 = vector.broadcast %cst_10 : f32 to vector<16x128xf32>
    %10 = arith.cmpf ogt, %8, %9 : vector<16x128xf32>
    %cst_11 = arith.constant 0.00999999977 : f32
    %11 = vector.broadcast %cst_11 : f32 to vector<16x128xf32>
    %12 = arith.mulf %11, %8 : vector<16x128xf32>
    %13 = arith.select %10, %8, %12 : vector<16x128xi1>, vector<16x128xf32>
    %c0_12 = arith.constant 0 : index
    %c0_13 = arith.constant 0 : index
    %14 = vector.load %arg5[%c0_12, %c0_13] : memref<128x128xf32, #tpu.memory_space<vmem>>, vector<128x128xf32>
    %cst_14 = arith.constant dense<0.000000e+00> : vector<16x128xf32>
    %15 = tpu.matmul %13, %14, %cst_14 {dimension_numbers = #tpu.dot_dimension_numbers<[1], [0], [0], [1], [0, 0, 1, 1], [], []>} : vector<16x128xf32>, vector<128x128xf32>, vector<16x128xf32> -> vector<16x128xf32>
    %c0_15 = arith.constant 0 : index
    %c0_16 = arith.constant 0 : index
    %16 = vector.load %arg6[%c0_15, %c0_16] : memref<1x128xf32, #tpu.memory_space<vmem>>, vector<1x128xf32>
    %17 = vector.broadcast %16 : vector<1x128xf32> to vector<16x128xf32>
    %18 = arith.addf %15, %17 : vector<16x128xf32>
    %cst_17 = arith.constant 0.000000e+00 : f32
    %19 = vector.broadcast %cst_17 : f32 to vector<16x128xf32>
    %20 = arith.cmpf ogt, %18, %19 : vector<16x128xf32>
    %cst_18 = arith.constant 0.00999999977 : f32
    %21 = vector.broadcast %cst_18 : f32 to vector<16x128xf32>
    %22 = arith.mulf %21, %18 : vector<16x128xf32>
    %23 = arith.select %20, %18, %22 : vector<16x128xi1>, vector<16x128xf32>
    %c0_19 = arith.constant 0 : index
    %c0_20 = arith.constant 0 : index
    %24 = vector.load %arg7[%c0_19, %c0_20] : memref<128x128xf32, #tpu.memory_space<vmem>>, vector<128x128xf32>
    %cst_21 = arith.constant dense<0.000000e+00> : vector<16x128xf32>
    %25 = tpu.matmul %23, %24, %cst_21 {dimension_numbers = #tpu.dot_dimension_numbers<[1], [0], [0], [1], [0, 0, 1, 1], [], []>} : vector<16x128xf32>, vector<128x128xf32>, vector<16x128xf32> -> vector<16x128xf32>
    %c0_22 = arith.constant 0 : index
    %c0_23 = arith.constant 0 : index
    %26 = vector.load %arg8[%c0_22, %c0_23] : memref<1x128xf32, #tpu.memory_space<vmem>>, vector<1x128xf32>
    %27 = vector.broadcast %26 : vector<1x128xf32> to vector<16x128xf32>
    %28 = arith.addf %25, %27 : vector<16x128xf32>
    %c0_24 = arith.constant 0 : index
    %c0_25 = arith.constant 0 : index
    %29 = vector.load %arg9[%c0_24, %c0_25] : memref<16x128xf32, #tpu.memory_space<vmem>>, vector<16x128xf32>
    tpu.vector_store %arg9[%c0_24, %c0_25], %28 {strides = array<i32>} : memref<16x128xf32, #tpu.memory_space<vmem>>, vector<16x128xf32>,
    return
  }
  func.func @transform_1(%arg0: i32, %arg1: memref<16xi32, #tpu.memory_space<smem>>) -> (i32, i32) {
    %c0_i32 = arith.constant 0 : i32
    %c0_i32_0 = arith.constant 0 : i32
    %c0_i32_1 = arith.constant 0 : i32
    return %c0_i32, %c0_i32_0 : i32, i32
  }
  func.func @transform_2(%arg0: i32, %arg1: memref<16xi32, #tpu.memory_space<smem>>) -> (i32, i32) {
    %c0_i32 = arith.constant 0 : i32
    %c0_i32_0 = arith.constant 0 : i32
    %c0_i32_1 = arith.constant 0 : i32
    return %c0_i32, %c0_i32_0 : i32, i32
  }
  func.func @transform_3(%arg0: i32, %arg1: memref<16xi32, #tpu.memory_space<smem>>) -> (i32, i32) {
    %c0_i32 = arith.constant 0 : i32
    %c0_i32_0 = arith.constant 0 : i32
    %c0_i32_1 = arith.constant 0 : i32
    return %c0_i32, %c0_i32_0 : i32, i32
  }
  func.func @transform_4(%arg0: i32, %arg1: memref<16xi32, #tpu.memory_space<smem>>) -> (i32, i32) {
    %c0_i32 = arith.constant 0 : i32
    %c0_i32_0 = arith.constant 0 : i32
    %c0_i32_1 = arith.constant 0 : i32
    return %c0_i32, %c0_i32_0 : i32, i32
  }
  func.func @transform_5(%arg0: i32, %arg1: memref<16xi32, #tpu.memory_space<smem>>) -> (i32, i32) {
    %c0_i32 = arith.constant 0 : i32
    %c0_i32_0 = arith.constant 0 : i32
    %c0_i32_1 = arith.constant 0 : i32
    return %c0_i32, %c0_i32_0 : i32, i32
  }
  func.func @transform_6(%arg0: i32, %arg1: memref<16xi32, #tpu.memory_space<smem>>) -> (i32, i32) {
    %c0_i32 = arith.constant 0 : i32
    %c0_i32_0 = arith.constant 0 : i32
    %c0_i32_1 = arith.constant 0 : i32
    return %c0_i32, %c0_i32_0 : i32, i32
  }
  func.func @transform_7(%arg0: i32, %arg1: memref<16xi32, #tpu.memory_space<smem>>) -> (i32, i32) {
    %c0_i32 = arith.constant 0 : i32
    %c0_i32_0 = arith.constant 0 : i32
    return %arg0, %c0_i32 : i32, i32
  }
}

</mosaic_0001>

<bundles_post_ra>
// kernel: tpu_custom_call.1
= control target key start
LH: loop header
LB: loop body
LE: loop exit
PB: predicated region body
PF: predicated region fallthrough
CT: control target
= control target key end

     0   :  { %s1041_s0 = inlined_call_operand.hbm [shape: s32[16], index: 0, kind: input, shape index: {}]   ;;  %s1042_s1 = inlined_call_operand.hbm [shape: f32[64,128], index: 1, kind: input, shape index: {}]   ;;  %s1043_s2 = inlined_call_operand.hbm [shape: f32[128,128], index: 2, kind: input, shape index: {}]   ;;  %s1044_s3 = inlined_call_operand.vmem [shape: f32[1,128], index: 3, kind: input, shape index: {}]   ;;  %s1045_s4 = inlined_call_operand.hbm [shape: f32[128,128], index: 4, kind: input, shape index: {}]   ;;  %s1046_s5 = inlined_call_operand.vmem [shape: f32[1,128], index: 5, kind: input, shape index: {}]   ;;  %s1047_s6 = inlined_call_operand.hbm [shape: f32[128,128], index: 6, kind: input, shape index: {}]   ;;  %s1048_s7 = inlined_call_operand.vmem [shape: f32[1,128], index: 7, kind: input, shape index: {}]   ;;  %s1049_s8 = inlined_call_operand.hbm [shape: f32[16,128], index: 8, kind: output, shape index: {}]  }
   0x1   :  { %s733_s29 = scalar_lea.hbm %s1041_s0, 16 }
   0x2   :  { %p734_p0 = scmp.ne.s32.totalorder %s1041_s0, %s733_s29  ;;  %p737_p1 = scmp.lt.u32.totalorder %s733_s29, %s1041_s0 }
   0x4   :  { %p739_p2 = pnand %p737_p1, %p734_p0 }
   0x6   :  { %742 = shalt.err (!%p739_p2)  }
   0x7   :  { %s881_s12 = smov [#allocation5]  }
   0x8   :  { %14 = dma.hbm_to_smem %s1041_s0, 16, %s881_s12, [#allocation4] }
   0x9   :  { %863 = dma.done.wait [#allocation4], 16 }
   0xa   :  { %864 = vsyncadd [#allocation4], 4294967280 }
   0xb   :  { %16 = sfence }
   0xc   :  { %17 = vsyncpa [#allocation7], 0 }
   0xd   :  { %18 = vsyncpa [#allocation10], 0 }
   0xe   :  { %19 = vsyncpa [#allocation8], 0  ;;  %s882_s15 = smov [#allocation9]   ;;  %s883_s17 = smov [#allocation6]  }
   0xf   :  { %s39_s16 = sshll.u32 %s882_s15, 4  ;;  %s25_s18 = sshll.u32 %s883_s17, 4  ;;  %s40_s16 = int_to_ptr.vmem [resolvable:$true] %s39_s16  ;;  %s946_s18 = int_to_ptr.vmem [resolvable:$true] %s25_s18 }
  0x10   :  { %s743_s21 = scalar_lea.hbm %s1045_s4, 2048 }
  0x11   :  { %p744_p3 = scmp.ne.s32.totalorder %s1045_s4, %s743_s21  ;;  %p747_p4 = scmp.lt.u32.totalorder %s743_s21, %s1045_s4 }
  0x13   :  { %p749_p5 = pnand %p747_p4, %p744_p3 }
  0x15   :  { %752 = shalt.err (!%p749_p5)
}
  0x16   :  { %s753_s25 = scalar_lea.vmem %s40_s16, 2048  ;;  %p758_p7 = scmp.lt.s32.totalorder %s40_s16, %s40_s16 }
  0x17   :  { %p754_p6 = scmp.ne.s32.totalorder %s40_s16, %s753_s25  ;;  %p759_p8 = scmp.lt.s32.totalorder %s753_s25, %s753_s25 }
  0x19   :  { %p760_p9 = por %p759_p8, %p758_p7 }
  0x1b   :  { %p761_p10 = pnand %p760_p9, %p754_p6 }
  0x1d   :  { %764 = shalt.err (!%p761_p10)
}
  0x1e   :  { %s884_s26 = smov 128   ;;  %s885_s27 = smov 8  }
  0x1f   :  { %45 = dma.hbm_to_vmem [thread:$0]  %s1045_s4, 2048, %s40_s16, [#allocation10], %s884_s26, %s884_s26, %s885_s27  }
  0x20   :  { %s765_s10 = scalar_lea.hbm %s1043_s2, 2048 }
  0x21   :  { %p766_p11 = scmp.ne.s32.totalorder %s1043_s2, %s765_s10  ;;  %p769_p12 = scmp.lt.u32.totalorder %s765_s10, %s1043_s2 }
  0x23   :  { %p771_p13 = pnand %p769_p12, %p766_p11 }
  0x25   :  { %774 = shalt.err (!%p771_p13)
}
  0x26   :  { %s775_s15 = scalar_lea.vmem %s946_s18, 2048  ;;  %p780_p1 = scmp.lt.s32.totalorder %s946_s18, %s946_s18 }
  0x27   :  { %p776_p0 = scmp.ne.s32.totalorder %s946_s18, %s775_s15  ;;  %p781_p2 = scmp.lt.s32.totalorder %s775_s15, %s775_s15 }
  0x29   :  { %p782_p3 = por %p781_p2, %p780_p1 }
  0x2b   :  { %p783_p4 = pnand %p782_p3, %p776_p0 }
  0x2d   :  { %786 = shalt.err (!%p783_p4)
}
  0x2e   :  { %31 = dma.hbm_to_vmem [thread:$0]  %s1043_s2, 2048, %s946_s18, [#allocation7], %s884_s26, %s884_s26, %s885_s27  }
  0x2f   :  { %s886_s17 = smov [#allocation11]   ;;  %s787_s22 = scalar_lea.hbm %s1047_s6, 2048 }
  0x30   :  { %s53_s19 = sshll.u32 %s886_s17, 4  ;;  %p788_p5 = scmp.ne.s32.totalorder %s1047_s6, %s787_s22  ;;  %s54_s19 = int_to_ptr.vmem [resolvable:$true] %s53_s19 }
  0x31   :  { %p791_p6 = scmp.lt.u32.totalorder %s787_s22, %s1047_s6 }
  0x33   :  { %p793_p7 = pnand %p791_p6, %p788_p5 }
  0x35   :  { %796 = shalt.err (!%p793_p7)
}
  0x36   :  { %s797_s28 = scalar_lea.vmem %s54_s19, 2048  ;;  %p802_p9 = scmp.lt.s32.totalorder %s54_s19, %s54_s19 }
  0x37   :  { %p798_p8 = scmp.ne.s32.totalorder %s54_s19, %s797_s28  ;;  %p803_p10 = scmp.lt.s32.totalorder %s797_s28, %s797_s28 }
  0x39   :  { %p804_p11 = por %p803_p10, %p802_p9 }
  0x3b   :  { %p805_p12 = pnand %p804_p11, %p798_p8 }
  0x3d   :  { %808 = shalt.err (!%p805_p12)
}
  0x3e   :  { %59 = dma.hbm_to_vmem [thread:$0]  %s1047_s6, 2048, %s54_s19, [#allocation10], %s884_s26, %s884_s26, %s885_s27  }
  0x3f   :  { %865 = dma.done.wait [#allocation7], 2048  }
  0x40   :  { %866 = vsyncadd [#allocation7], 4294965248 }
  0x41   :  { %867 = dma.done.wait [#allocation10], 4096  }
  0x42   :  { %868 = vsyncadd [#allocation10], 4294963200  ;;  %s998_s29 = smov 0  }
  0x43 LB: > { %s79_s30 = sld [smem:[#allocation5 + %s875_s29]]  ;;  %s82_s9 = scalar_lea.vmem [#allocation2], %s875_s29  ;;  %s875_s29 = sphi %s998_s29, %s77_s29  }
  0x44   : > { %s90_s10 = sshll.u32 %s82_s9, 4  ;;  %s811_s16 = scalar_lea.hbm %s1042_s1, 1024  ;;  %s91_s10 = int_to_ptr.vmem [resolvable:$true] %s90_s10 }
  0x49   : > { %s450_s11 = sshll.u32 %s79_s30, 4 }
  0x4a   : > { %s81_s13 = scalar_lea.hbm %s1042_s1, %s450_s11 }
  0x4b   : > { %s809_s14 = scalar_lea.hbm %s81_s13, 16  ;;  %p812_p0 = scmp.lt.u32.totalorder %s81_s13, %s1042_s1 }
  0x4c   : > { %p810_p13 = scmp.ne.s32.totalorder %s81_s13, %s809_s14  ;;  %p813_p1 = scmp.lt.u32.totalorder %s811_s16, %s809_s14 }
  0x4d   : > { %p815_p3 = scmp.lt.u32.totalorder %s809_s14, %s81_s13 }
  0x4e   : > { %p814_p2 = por %p813_p1, %p812_p0 }
  0x50   : > { %p816_p4 = por %p815_p3, %p814_p2 }
  0x52   : > { %p817_p5 = pnand %p816_p4, %p810_p13 }
  0x54   : > { %820 = shalt.err (!%p817_p5)  }
  0x55   : > { %s821_s20 = scalar_lea.vmem %s91_s10, 16  ;;  %s887_s21 = smov [#allocation2]  }
  0x56   : > { %p822_p6 = scmp.ne.s32.totalorder %s91_s10, %s821_s20  ;;  %s823_s22 = sshll.u32 %s887_s21, 4  ;;  %s824_s22 = int_to_ptr.vmem [resolvable:$false] %s823_s22 }
  0x57   : > { %s825_s23 = scalar_lea.vmem %s824_s22, 256  ;;  %p826_p7 = scmp.lt.s32.totalorder %s91_s10, %s824_s22 }
  0x58   : > { %p827_p8 = scmp.lt.s32.totalorder %s825_s23, %s821_s20 }
  0x5a   : > { %p828_p9 = por %p827_p8, %p826_p7 }
  0x5c   : > { %p829_p10 = pnand %p828_p9, %p822_p6 }
  0x5e   : > { %832 = shalt.err (!%p829_p10)  }
  0x5f   : > { %93 = dma.hbm_to_vmem [thread:$0]  %s81_s13, 16, %s91_s10, [#allocation3] }
  0x60   : > { %s77_s29 = sadd.s32 1, %s875_s29  }
  0x61   : > { %p74_p11 = scmp.ge.s32.totalorder %s77_s29, 16  }
  0x62   :  { %s877_s0 = smov (%p74_p11), 0  }
  0x63   :  { %76 = sbr.rel (!%p74_p11) target bundleno = 67 (0x43), region = 76 }
  0x6a LB: > { %869 = dma.done.wait [#allocation3], 16  ;;  %s879_s0 = sphi %s877_s0, %s99_s0  }
  0x6b   : > { %870 = vsyncadd [#allocation3], 4294967280  ;;  %s99_s0 = sadd.s32 1, %s879_s0  }
  0x6c   : > { %p96_p12 = scmp.ge.s32.totalorder %s99_s0, 16  }
  0x6d   :  { %v105_v0 = vld [vmem:[#allocation6] sm:$0xff] (%p96_p12)  ;;  %v106_v1 = vld [vmem:[#allocation6 + $0x8] sm:$0xff] (%p96_p12)  ;;  %v107_v2 = vld [vmem:[#allocation6 + $0x10] sm:$0xff] (%p96_p12)  ;;  %s888_s18 = smov (%p96_p12), [#allocation12]  }
  0x6e   :  { %98 = sbr.rel (!%p96_p12) target bundleno = 106 (0x6a), region = 87  ;;  %v614_v3 = vpack.c.bf16 (%p96_p12), %v106_v1, %v105_v0  ;;  %v108_v4 = vld [vmem:[#allocation6 + $0x18] sm:$0xff] (%p96_p12)  ;;  %v109_v6 = vld [vmem:[#allocation6 + $0x20] sm:$0xff] (%p96_p12)  ;;  %v110_v7 = vld [vmem:[#allocation6 + $0x28] sm:$0xff] (%p96_p12)  ;;  %s418_s29 = sshll.u32 (%p96_p12), %s888_s18, 4  ;;  %s419_s29 = int_to_ptr.vmem [resolvable:$true] %s418_s29 }
  0x6f   :  { %v618_v5 = vpack.c.bf16 (%p96_p12), %v108_v4, %v107_v2  ;;  %v622_v8 = vpack.c.bf16 (%p96_p12), %v110_v7, %v109_v6  ;;  %v111_v9 = vld [vmem:[#allocation6 + $0x30] sm:$0xff] (%p96_p12)  ;;  %v112_v10 = vld [vmem:[#allocation6 + $0x38] sm:$0xff] (%p96_p12)  ;;  %v209_v12 = vld [vmem:[#allocation9] sm:$0xff] (%p96_p12)  ;;  %p838_p0 = scmp.lt.s32.totalorder (%p96_p12), %s419_s29, %s419_s29 }
  0x70   :  { %615 = vmatprep.subr.bf16.mxu0 (%p96_p12), %v614_v3  ;;  %v103_v11 = vld [vmem:[#allocation2] sm:$0xff] (%p96_p12)  ;;  %v210_v13 = vld [vmem:[#allocation9 + $0x8] sm:$0xff] (%p96_p12)  ;;  %v212_v16 = vld [vmem:[#allocation9 + $0x18] sm:$0xff] (%p96_p12)  ;;  %v626_v20 = vpack.c.bf16 (%p96_p12), %v112_v10, %v111_v9 }
  0x71   :  { %617 = vmatpush3.bf16.msra.mxu0 (%p96_p12), %v614_v3  ;;  %541 = vmatprep.mubr.f32.mxu0 (%p96_p12), %v103_v11  ;;  %v211_v14 = vld [vmem:[#allocation9 + $0x10] sm:$0xff] (%p96_p12)  ;;  %v646_v15 = vpack.c.bf16 (%p96_p12), %v210_v13, %v209_v12  ;;  %v213_v18 = vld [vmem:[#allocation9 + $0x20] sm:$0xff] (%p96_p12)  ;;  %v214_v19 = vld [vmem:[#allocation9 + $0x28] sm:$0xff] (%p96_p12) }
  0x72   :  { %619 = vmatprep.subr.bf16.mxu0 (%p96_p12), %v618_v5  ;;  %v650_v17 = vpack.c.bf16 (%p96_p12), %v212_v16, %v211_v14  ;;  %v113_v21 = vld [vmem:[#allocation6 + $0x40] sm:$0xff] (%p96_p12)  ;;  %v114_v22 = vld [vmem:[#allocation6 + $0x48] sm:$0xff] (%p96_p12)  ;;  %v654_v23 = vpack.c.bf16 (%p96_p12), %v214_v19, %v213_v18  ;;  %v215_v24 = vld [vmem:[#allocation9 + $0x30] sm:$0xff] (%p96_p12) }
  0x73   :  { %647 = vmatprep.subr.bf16.mxu1 (%p96_p12), %v646_v15  ;;  %v216_v25 = vld [vmem:[#allocation9 + $0x38] sm:$0xff] (%p96_p12)  ;;  %v630_v26 = vpack.c.bf16 (%p96_p12), %v114_v22, %v113_v21  ;;  %v115_v27 = vld [vmem:[#allocation6 + $0x50] sm:$0xff] (%p96_p12)  ;;  %v217_v30 = vld [vmem:[#allocation9 + $0x40] sm:$0xff] (%p96_p12) }
  0x74   :  { %649 = vmatpush3.bf16.msra.mxu1 (%p96_p12), %v646_v15  ;;  %v116_v28 = vld [vmem:[#allocation6 + $0x58] sm:$0xff] (%p96_p12)  ;;  %v658_v29 = vpack.c.bf16 (%p96_p12), %v216_v25, %v215_v24  ;;  %v218_v31 = vld [vmem:[#allocation9 + $0x48] sm:$0xff] (%p96_p12)  ;;  %v117_v33 = vld [vmem:[#allocation6 + $0x60] sm:$0xff] (%p96_p12) }
  0x75   :  { %621 = vmatpush3.bf16.msra.mxu0 %v618_v5  ;;  %651 = vmatprep.subr.bf16.mxu1 %v650_v17  ;;  %v634_v32 = vpack.c.bf16 %v116_v28, %v115_v27  ;;  %v118_v34 = vld [vmem:[#allocation6 + $0x68] sm:$0xff]  ;;  %v662_v35 = vpack.c.bf16 %v218_v31, %v217_v30  ;;  %v219_v36 = vld [vmem:[#allocation9 + $0x50] sm:$0xff]  ;;  %v220_v37 = vld [vmem:[#allocation9 + $0x58] sm:$0xff] }
  0x76   :  { %623 = vmatprep.subr.bf16.mxu0 %v622_v8  ;;  %v638_v38 = vpack.c.bf16 %v118_v34, %v117_v33  ;;  %v119_v39 = vld [vmem:[#allocation6 + $0x70] sm:$0xff]  ;;  %v120_v40 = vld [vmem:[#allocation6 + $0x78] sm:$0xff]  ;;  %v666_v41 = vpack.c.bf16 %v220_v37, %v219_v36  ;;  %v221_v44 = vld [vmem:[#allocation9 + $0x60] sm:$0xff] }
  0x77   :  { %v642_v42 = vpack.c.bf16 %v120_v40, %v119_v39  ;;  %v104_v43 = vld [vmem:[#allocation2 + $0x8] sm:$0xff]  ;;  %v222_v45 = vld [vmem:[#allocation9 + $0x68] sm:$0xff]  ;;  %v223_v47 = vld [vmem:[#allocation9 + $0x70] sm:$0xff] }
  0x78   :  { %653 = vmatpush3.bf16.msra.mxu1 %v650_v17  ;;  %v670_v46 = vpack.c.bf16 %v222_v45, %v221_v44  ;;  %v224_v48 = vld [vmem:[#allocation9 + $0x78] sm:$0xff]  ;;  %v313_v50 = vld [vmem:[#allocation11] sm:$0xff]  ;;  %v314_v51 = vld [vmem:[#allocation11 + $0x8] sm:$0xff] }
  0x79   :  { %625 = vmatpush3.bf16.msra.mxu0 %v622_v8  ;;  %655 = vmatprep.subr.bf16.mxu1 %v654_v23  ;;  %v674_v49 = vpack.c.bf16 %v224_v48, %v223_v47  ;;  %v315_v52 = vld [vmem:[#allocation11 + $0x10] sm:$0xff]  ;;  %v678_v53 = vpack.c.bf16 %v314_v51, %v313_v50  ;;  %v316_v54 = vld [vmem:[#allocation11 + $0x18] sm:$0xff]  ;;  %v317_v56 = vld [vmem:[#allocation11 + $0x20] sm:$0xff] }
  0x7a   :  { %627 = vmatprep.subr.bf16.mxu0 %v626_v20  ;;  %v682_v55 = vpack.c.bf16 %v316_v54, %v315_v52  ;;  %v318_v57 = vld [vmem:[#allocation11 + $0x28] sm:$0xff]  ;;  %v319_v59 = vld [vmem:[#allocation11 + $0x30] sm:$0xff]  ;;  %v320_v60 = vld [vmem:[#allocation11 + $0x38] sm:$0xff] }
  0x7b   :  { %v686_v58 = vpack.c.bf16 %v318_v57, %v317_v56  ;;  %v690_v61 = vpack.c.bf16 %v320_v60, %v319_v59  ;;  %v321_v62 = vld [vmem:[#allocation11 + $0x40] sm:$0xff]  ;;  %v322_v63 = vld [vmem:[#allocation11 + $0x48] sm:$0xff]  ;;  %v323_v1 = vld [vmem:[#allocation11 + $0x50] sm:$0xff] }
  0x7c   :  { %657 = vmatpush3.bf16.msra.mxu1 %v654_v23  ;;  %v694_v0 = vpack.c.bf16 %v322_v63, %v321_v62  ;;  %v324_v2 = vld [vmem:[#allocation11 + $0x58] sm:$0xff]  ;;  %v451_v4 = vld [vmem:[%s1044_s3] ss:$0 sm:$0xff]  ;;  %v325_v13 = vld [vmem:[#allocation11 + $0x60] sm:$0xff] }
  0x7d   :  { %629 = vmatpush3.bf16.msra.mxu0 %v626_v20  ;;  %659 = vmatprep.subr.bf16.mxu1 %v658_v29  ;;  %v698_v3 = vpack.c.bf16 %v324_v2, %v323_v1  ;;  %v326_v14 = vld [vmem:[#allocation11 + $0x68] sm:$0xff]  ;;  %v327_v16 = vld [vmem:[#allocation11 + $0x70] sm:$0xff]  ;;  %v328_v17 = vld [vmem:[#allocation11 + $0x78] sm:$0xff] }
  0x7e   :  { %631 = vmatprep.subr.bf16.mxu0 %v630_v26  ;;  %v702_v15 = vpack.c.bf16 %v326_v14, %v325_v13  ;;  %v706_v18 = vpack.c.bf16 %v328_v17, %v327_v16  ;;  %v452_v19 = vld [vmem:[%s1046_s5] ss:$0 sm:$0xff]  ;;  %s833_s5 = scalar_lea.vmem %s419_s29, 256 }
  0x7f   :  { %v453_v28 = vld [vmem:[%s1048_s7] ss:$0 sm:$0xff]  ;;  %p834_p13 = scmp.ne.s32.totalorder %s419_s29, %s833_s5  ;;  %p839_p1 = scmp.lt.s32.totalorder %s833_s5, %s833_s5 }
  0x80   :  { %661 = vmatpush3.bf16.msra.mxu1 %v658_v29 }
  0x81   :  { %633 = vmatpush3.bf16.msra.mxu0 %v630_v26  ;;  %663 = vmatprep.subr.bf16.mxu1 %v662_v35  ;;  %p840_p2 = por %p839_p1, %p838_p0 }
  0x82   :  { %635 = vmatprep.subr.bf16.mxu0 %v634_v32 }
  0x83   :  { %p841_p3 = pnand %p840_p2, %p834_p13 }
  0x84   :  { %665 = vmatpush3.bf16.msra.mxu1 %v662_v35 }
  0x85   :  { %637 = vmatpush3.bf16.msra.mxu0 %v634_v32  ;;  %667 = vmatprep.subr.bf16.mxu1 %v666_v41 }
  0x86   :  { %639 = vmatprep.subr.bf16.mxu0 %v638_v38 }
  0x88   :  { %669 = vmatpush3.bf16.msra.mxu1 %v666_v41 }
  0x89   :  { %641 = vmatpush3.bf16.msra.mxu0 %v638_v38  ;;  %671 = vmatprep.subr.bf16.mxu1 %v670_v46 }
  0x8a   :  { %643 = vmatprep.subr.bf16.mxu0 %v642_v42 }
  0x8c   :  { %673 = vmatpush3.bf16.msra.mxu1 %v670_v46 }
  0x8d   :  { %645 = vmatpush3.bf16.msra.mxu0 %v642_v42  ;;  %675 = vmatprep.subr.bf16.mxu1 %v674_v49 }
  0x8e   :  { %679 = vmatprep.subr.bf16.mxu0 %v678_v53 }
  0x90   :  { %542 = vmatmul.mubr.f32.vlgmr.msra.gmra.mrb[0].mxu0 %v104_v43  ;;  %677 = vmatpush3.bf16.msra.mxu1 %v674_v49 }
  0x91   :  { %681 = vmatpush3.bf16.msra.mxu0 %v678_v53 }
  0x92   :  { %683 = vmatprep.subr.bf16.mxu0 %v682_v55 }
  0x95   :  { %685 = vmatpush3.bf16.msra.mxu0 %v682_v55 }
  0x96   :  { %687 = vmatprep.subr.bf16.mxu0 %v686_v58 }
  0x99   :  { %689 = vmatpush3.bf16.msra.mxu0 %v686_v58 }
  0x9a   :  { %691 = vmatprep.subr.bf16.mxu0 %v690_v61 }
  0x9d   :  { %693 = vmatpush3.bf16.msra.mxu0 %v690_v61 }
  0x9e   :  { %695 = vmatprep.subr.bf16.mxu0 %v694_v0 }
  0xa1   :  { %697 = vmatpush3.bf16.msra.mxu0 %v694_v0 }
  0xa2   :  { %699 = vmatprep.subr.bf16.mxu0 %v698_v3 }
  0xa5   :  { %701 = vmatpush3.bf16.msra.mxu0 %v698_v3 }
  0xa6   :  { %703 = vmatprep.subr.bf16.mxu0 %v702_v15 }
  0xa9   :  { %705 = vmatpush3.bf16.msra.mxu0 %v702_v15 }
  0xaa   :  { %707 = vmatprep.subr.bf16.mxu0 %v706_v18 }
  0xad   :  { %709 = vmatpush3.bf16.msra.mxu0 %v706_v18 }
 0x163   :  { %v543_v5 = vpop.f32.mrb[0].mxu0 }
 0x164   :  { %v200_v6 = vadd.f32 %v543_v5, %v451_v4  ;;  %v194_v7 = vpop.f32.mrb[1].mxu0 }
 0x165   :  { %v195_v8 = vadd.f32 %v451_v4, %v194_v7 }
 0x166   :  { %v206_v9 = vmul.f32 0.01, %v200_v6  ;;  %vm204_vm1 = vcmp.gt.f32.partialorder %v200_v6, 0.0 }
 0x167   :  { %vm203_vm0 = vcmp.gt.f32.partialorder %v195_v8, 0.0  ;;  %v205_v10 = vmul.f32 0.01, %v195_v8 }
 0x168   :  { %v208_v12 = vsel %vm204_vm1, %v200_v6, %v206_v9 }
 0x169   :  { %v207_v11 = vsel %vm203_vm0, %v195_v8, %v205_v10 }
 0x16a   :  { %576 = vmatprep.mubr.f32.mxu1 %v207_v11 }
 0x16b   :  { %577 = vmatmul.mubr.f32.vlgmr.msra.gmra.mrb[0].mxu1 %v208_v12 }
 0x23e   :  { %v578_v20 = vpop.f32.mrb[0].mxu1 }
 0x23f   :  { %v304_v21 = vadd.f32 %v578_v20, %v452_v19  ;;  %v298_v22 = vpop.f32.mrb[1].mxu1 }
 0x240   :  { %v299_v23 = vadd.f32 %v452_v19, %v298_v22 }
 0x241   :  { %v310_v24 = vmul.f32 0.01, %v304_v21  ;;  %vm308_vm2 = vcmp.gt.f32.partialorder %v304_v21, 0.0 }
 0x242   :  { %v309_v25 = vmul.f32 0.01, %v299_v23  ;;  %vm307_vm3 = vcmp.gt.f32.partialorder %v299_v23, 0.0 }
 0x243   :  { %v312_v27 = vsel %vm308_vm2, %v304_v21, %v310_v24 }
 0x244   :  { %v311_v26 = vsel %vm307_vm3, %v299_v23, %v309_v25 }
 0x245   :  { %611 = vmatprep.mubr.f32.mxu0 %v311_v26 }
 0x246   :  { %612 = vmatmul.mubr.f32.vlgmr.msra.gmra.mrb[2].mxu0 %v312_v27 }
 0x319   :  { %v613_v29 = vpop.f32.mrb[2].mxu0 }
 0x31a   :  { %v408_v30 = vadd.f32 %v613_v29, %v453_v28  ;;  %v402_v31 = vpop.f32.mrb[3].mxu0 }
 0x31b   :  { %v403_v32 = vadd.f32 %v453_v28, %v402_v31 }
 0x31c   :  { %412 = vst [vmem:[#allocation12 + $0x8] sm:$0xff] %v408_v30 }
 0x31d   :  { %411 = vst [vmem:[#allocation12] sm:$0xff] %v403_v32 }
 0x31e   :  { %844 = shalt.err (!%p841_p3)
}
 0x31f   :  { %s845_s7 = scalar_lea.hbm %s1049_s8, 256 }
 0x320   :  { %p846_p4 = scmp.ne.s32.totalorder %s1049_s8, %s845_s7  ;;  %p849_p5 = scmp.lt.u32.totalorder %s845_s7, %s1049_s8 }
 0x322   :  { %p851_p6 = pnand %p849_p5, %p846_p4 }
 0x324   :  { %854 = shalt.err (!%p851_p6)
}
 0x325   :  { %424 = dma.vmem_to_hbm [thread:$0]  %s419_s29, 256, %s1049_s8, [#allocation8], %s884_s26, %s884_s26, %s885_s27  }
 0x326   :  { %871 = dma.done.wait [#allocation8], 256  }
 0x327   :  { %872 = vsyncadd [#allocation8], 4294967040 }
 0x328   :  { %428 = vsyncpa [#allocation7], 1 }
 0x329   :  { %429 = vsyncpa [#allocation10], 1 }
 0x32a   :  { %430 = vsyncpa [#allocation8], 1 }
 0x32b   :  { %431 = vsyncmov [#allocation3] }
 0x32e   :  { %s432_s15 = vpop.sfrf %431 }
 0x32f   :  { %p454_p7 = scmp.ne.s32.totalorder %s432_s15, 0 }
 0x331   :  { %436 = shalt.err (%p454_p7)  }

</bundles_post_ra>
